<compile_context>
chip_gen: v6e
topology: v6e:2x2x1
jax: 0.10.0
libtpu: 0.0.40
codegen_flags: <defaults>
</compile_context>

<pallas_src>
import numpy as np

import jax
import jax.numpy as jnp
from jax import lax
from jax.experimental import pallas as pl
from jax.experimental.pallas import tpu as pltpu


def _plan_hw(hw, cap):
    """Return (hw_pad, chunk, nchunks) for tiling the flattened HW axis."""
    cap = max(128, (cap // 128) * 128)
    if hw <= cap:
        return hw, hw, 1                      # single chunk == full array dim
    divs = [c for c in range(128, cap + 1, 128) if hw % c == 0]
    if divs:                                  # exact 128-multiple divisor
        c = max(divs)
        return hw, c, hw // c
    c = cap                                   # pad HW up to a chunk multiple
    hw_pad = ((hw + c - 1) // c) * c
    return hw_pad, c, hw_pad // c


def _make_gproj_kernel(N, n_maps, map_meta, consts, compute_dtype, kmax):
    (mesh_x, mesh_y, cf0, cf1, half_w, half_h, ccoff_w, ccoff_h) = consts

    def kernel(pos_ref, *rest):
        # pos_ref  : (1, N, 3) f32                       raw vertex inputs
        # per map  : img (1, C, chunk) compute_dtype, sx (1, chunk) f32,
        #            sy (1, chunk) f32
        # rest[3*n_maps]        : (1, N, c_pad) f32      fused output block
        # rest[3*n_maps+1 + m]  : (C_m, N) f32           per-map accumulator
        out_ref = rest[3 * n_maps]
        k = pl.program_id(1)

        p = pos_ref[0]                                    # (N, 3)

        @pl.when(k == 0)
        def _():
            out_ref[0, :, 0:3] = p                        # inputs passthrough

        # GProjection.forward (orthographic=True, tensorflow_compatible=False).
        # (N, 1) scalar-ish work; recomputed per k on purpose (cheaper than a
        # scratch round-trip, per review this is a minor item).
        px = p[:, 0:1] + mesh_x                           # (N, 1)
        py = p[:, 1:2] + mesh_y
        wn = jnp.clip(-cf0 * px / half_w + ccoff_w / half_w, -1.0, 1.0)
        hn = jnp.clip(cf1 * py / half_h + ccoff_h / half_h, -1.0, 1.0)

        for m, (C, H, W, _chunk, nchunks, c_lo, c_hi) in enumerate(map_meta):
            img_ref = rest[3 * m]                         # (1, C, chunk)
            sx_ref = rest[3 * m + 1]                      # (1, chunk) f32
            sy_ref = rest[3 * m + 2]                      # (1, chunk) f32
            acc_ref = rest[3 * n_maps + 1 + m]            # (C, N) f32

            # grid_sample source coords (align_corners=False), f32, (N, 1).
            ix = ((wn + 1.0) * W - 1.0) * 0.5             # in [-0.5, W-0.5]
            iy = ((hn + 1.0) * H - 1.0) * 0.5             # in [-0.5, H-0.5]

            def contrib(ix=ix, iy=iy, img_ref=img_ref, sx_ref=sx_ref,
                        sy_ref=sy_ref, acc_ref=acc_ref, nchunks=nchunks,
                        c_lo=c_lo, c_hi=c_hi):
                sx = sx_ref[...]                          # (1, chunk) f32
                sy = sy_ref[...]
                # Exact f32 coordinate differences, then triangle weights and
                # the row*col product in compute_dtype (bf16 on v6e/v7x).
                dx = (sx - ix).astype(compute_dtype)      # (N, chunk)
                dy = (sy - iy).astype(compute_dtype)
                colf = jnp.maximum(1.0 - jnp.abs(dx), 0.0)
                rowf = jnp.maximum(1.0 - jnp.abs(dy), 0.0)
                wmat = colf * rowf                        # (N, chunk)
                img_c = img_ref[0]                        # (C, chunk)
                # (C, N): N on the MXU result / store lane axis (lane-dense).
                part = lax.dot_general(
                    img_c, wmat,
                    dimension_numbers=(((1,), (1,)), ((), ())),
                    preferred_element_type=jnp.float32)

                @pl.when(k == 0)
                def _():
                    acc_ref[...] = part

                @pl.when(k > 0)
                def _():
                    acc_ref[...] = acc_ref[...] + part

                # Single sub-128-lane column write per (batch, map): one XLU
                # transpose at this map's final chunk.
                @pl.when(k == nchunks - 1)
                def _():
                    out_ref[0, :, c_lo:c_hi] = acc_ref[...].T

            if nchunks == kmax:
                contrib()
            else:
                pl.when(k < nchunks)(contrib)

    return kernel


def gprojection_forward(resolution, img_features_nchw, inputs, mesh_pos,
                        camera_f, camera_c, *, compute_dtype=jnp.bfloat16,
                        hw_chunk_cap=1024, pad_output_lanes=True):
    """Pallas implementation of GProjection.forward
    (orthographic=True, tensorflow_compatible=False, bound=0)."""
    resolution = np.asarray(resolution, dtype=np.float64)
    half_res = (resolution - 1.0) / 2.0
    cc_off = np.asarray(camera_c, dtype=np.float64) - half_res

    inputs = inputs.astype(jnp.float32)
    B, N, _ = inputs.shape
    isz = jnp.dtype(compute_dtype).itemsize

    call_inputs = [inputs]
    in_specs = [pl.BlockSpec((1, N, 3), lambda b, k: (b, 0, 0))]
    scratch_shapes = []
    map_meta = []                 # (C, H, W, chunk, nchunks, c_lo, c_hi)

    col = 3
    resident_bytes = 2 * N * 3 * 4
    work_bytes = 0
    for img in img_features_nchw:
        Bi, C, H, W = img.shape
        assert Bi == B
        HW = H * W
        hw_pad, chunk, nchunks = _plan_hw(HW, hw_chunk_cap)

        # Free row-major reshape; zero-pad only when HW needs 128-chunking;
        # cast to compute_dtype in the wrapper (halves DMA bytes at bf16).
        img_flat = img.reshape(B, C, HW)
        if hw_pad > HW:
            img_flat = jnp.pad(img_flat, ((0, 0), (0, 0), (0, hw_pad - HW)))
        img_flat = img_flat.astype(compute_dtype)

        # Float pixel-coordinate tables (trace-time): sx[j]=j%W, sy[j]=j//W.
        # Padded entries are -2.0 -> triangle weight exactly 0.
        sx_np = np.full((1, hw_pad), -2.0, dtype=np.float32)
        sy_np = np.full((1, hw_pad), -2.0, dtype=np.float32)
        sx_np[0, :HW] = np.tile(np.arange(W, dtype=np.float32), H)
        sy_np[0, :HW] = np.repeat(np.arange(H, dtype=np.float32), W)

        def _img_map(b, k, n=nchunks):
            return (b, 0, jnp.minimum(k, n - 1))

        def _tab_map(b, k, n=nchunks):
            return (0, jnp.minimum(k, n - 1))

        call_inputs += [img_flat, jnp.asarray(sx_np), jnp.asarray(sy_np)]
        in_specs += [pl.BlockSpec((1, C, chunk), _img_map),
                     pl.BlockSpec((1, chunk), _tab_map),
                     pl.BlockSpec((1, chunk), _tab_map)]
        scratch_shapes.append(pltpu.VMEM((C, N), jnp.float32))
        map_meta.append((C, H, W, chunk, nchunks, col, col + C))
        col += C

        resident_bytes += 2 * C * chunk * isz + 4 * chunk * 4 + C * N * 4
        work_bytes = max(work_bytes,
                         N * chunk * (2 * 4 + 3 * isz) + C * N * 4)

    n_maps = len(map_meta)
    kmax = max((m[4] for m in map_meta), default=1)
    c_total = col
    c_pad = ((c_total + 127) // 128) * 128 if pad_output_lanes else c_total
    resident_bytes += N * c_pad * 4

    vmem_limit = int(min(100 * 2**20,
                         max(32 * 2**20,
                             int(1.5 * (resident_bytes + work_bytes)))))

    consts = (float(mesh_pos[0]), float(mesh_pos[1]),
              float(camera_f[0]), float(camera_f[1]),
              float(half_res[0]), float(half_res[1]),
              float(cc_off[0]), float(cc_off[1]))
    kernel = _make_gproj_kernel(N, n_maps, map_meta, consts,
                                compute_dtype, kmax)

    out = pl.pallas_call(
        kernel,
        out_shape=jax.ShapeDtypeStruct((B, N, c_pad), jnp.float32),
        grid_spec=pltpu.PrefetchScalarGridSpec(
            num_scalar_prefetch=0,
            grid=(B, kmax),
            in_specs=in_specs,
            out_specs=pl.BlockSpec((1, N, c_pad), lambda b, k: (b, 0, 0)),
            scratch_shapes=scratch_shapes),
        compiler_params=pltpu.CompilerParams(
            dimension_semantics=("parallel", "arbitrary"),
            vmem_limit_bytes=vmem_limit),
    )(*call_inputs)

    return out[..., :c_total] if c_pad != c_total else out


def _reference(resolution, img_features_nchw, inputs,
               mesh_pos, camera_f, camera_c):
    """Pure-JAX reference reproducing the PyTorch semantics."""
    resolution = np.asarray(resolution, dtype=np.float64)
    half_res = (resolution - 1.0) / 2.0
    cc_off = np.asarray(camera_c, dtype=np.float64) - half_res

    pos = inputs + jnp.asarray(mesh_pos, dtype=jnp.float32)
    w = (-camera_f[0] * pos[:, :, 0] / half_res[0]
         + cc_off[0] / half_res[0])
    h = (camera_f[1] * pos[:, :, 1] / half_res[1]
         + cc_off[1] / half_res[1])
    w = jnp.clip(w, -1.0, 1.0)
    h = jnp.clip(h, -1.0, 1.0)

    feats = [inputs]
    for img in img_features_nchw:
        B, C, H, W = img.shape
        ix = ((w + 1.0) * W - 1.0) * 0.5
        iy = ((h + 1.0) * H - 1.0) * 0.5
        ix0 = jnp.floor(ix)
        iy0 = jnp.floor(iy)
        ix1 = ix0 + 1.0
        iy1 = iy0 + 1.0

        def gather(xf, yf):
            xi = xf.astype(jnp.int32)
            yi = yf.astype(jnp.int32)
            inb = ((xi >= 0) & (xi < W) & (yi >= 0) & (yi < H))
            xc = jnp.clip(xi, 0, W - 1)
            yc = jnp.clip(yi, 0, H - 1)
            flat = yc * W + xc                                      # (B, N)
            imgf = img.reshape(B, C, H * W)
            g = jnp.take_along_axis(imgf, flat[:, None, :], axis=2)  # (B,C,N)
            return g * inb[:, None, :].astype(img.dtype)

        w00 = (ix1 - ix) * (iy1 - iy)
        w10 = (ix - ix0) * (iy1 - iy)
        w01 = (ix1 - ix) * (iy - iy0)
        w11 = (ix - ix0) * (iy - iy0)
        out = (gather(ix0, iy0) * w00[:, None, :]
               + gather(ix1, iy0) * w10[:, None, :]
               + gather(ix0, iy1) * w01[:, None, :]
               + gather(ix1, iy1) * w11[:, None, :])                # (B, C, N)
        feats.append(jnp.transpose(out, (0, 2, 1)))
    return jnp.concatenate(feats, axis=2)


if __name__ == "__main__":
    # GProjection constructor args, Pixel2Mesh-like, deterministic.
    mesh_pos = [0.0, 0.0, -0.8]
    camera_f = [248.0, 248.0]
    camera_c = [111.5, 111.5]
    resolution = np.array([224.0, 224.0], dtype=np.float64)

    B, N = 2, 8
    key = jax.random.PRNGKey(0)
    k1, k2, k3, k4 = jax.random.split(key, 4)
    inputs = (0.3 * jax.random.normal(k1, (B, N, 3))).astype(jnp.float32)
    img_feat_a = jax.random.normal(k2, (B, 4, 16, 16)).astype(jnp.float32)
    img_feat_b = jax.random.normal(k3, (B, 8, 8, 8)).astype(jnp.float32)
    img_feat_c = jax.random.normal(k4, (B, 6, 12, 12)).astype(jnp.float32)
    img_features = [img_feat_a, img_feat_b, img_feat_c]
    c_total = 3 + 4 + 8 + 6

    ref = jax.block_until_ready(_reference(resolution, img_features, inputs,
                                           mesh_pos, camera_f, camera_c))

    # 1) Exact-semantics check: f32 path, tiny hw_chunk_cap so the chunked HW
    #    reduction, the map-with-fewer-chunks guard, and the HW-padding path
    #    (12x12=144 -> padded to 256) are all exercised.
    out_f32 = gprojection_forward(resolution, img_features, inputs,
                                  mesh_pos, camera_f, camera_c,
                                  compute_dtype=jnp.float32, hw_chunk_cap=128)
    out_f32 = jax.block_until_ready(out_f32)
    assert out_f32.shape == (B, N, c_total), out_f32.shape
    np.testing.assert_allclose(np.asarray(out_f32), np.asarray(ref),
                               rtol=1e-3, atol=1e-3)

    # 2) Fast path (default): bf16 image DMA + bf16 slab math, f32 accumulate.
    out_bf16 = jax.block_until_ready(
        gprojection_forward(resolution, img_features, inputs,
                            mesh_pos, camera_f, camera_c))
    assert out_bf16.shape == (B, N, c_total), out_bf16.shape
    np.testing.assert_allclose(np.asarray(out_bf16), np.asarray(ref),
                               rtol=2e-2, atol=2e-2)

    print("KERNEL_OK")
</pallas_src>

<mosaic_0001>
module attributes {stable_mosaic.version = 11 : i64} {
  func.func @kernel(%arg0: i32, %arg1: i32, %arg2: memref<1x8x3xf32, #tpu.memory_space<vmem>>, %arg3: memref<1x4x128xf32, #tpu.memory_space<vmem>>, %arg4: memref<1x128xf32, #tpu.memory_space<vmem>>, %arg5: memref<1x128xf32, #tpu.memory_space<vmem>>, %arg6: memref<1x8x64xf32, #tpu.memory_space<vmem>>, %arg7: memref<1x64xf32, #tpu.memory_space<vmem>>, %arg8: memref<1x64xf32, #tpu.memory_space<vmem>>, %arg9: memref<1x6x128xf32, #tpu.memory_space<vmem>>, %arg10: memref<1x128xf32, #tpu.memory_space<vmem>>, %arg11: memref<1x128xf32, #tpu.memory_space<vmem>>, %arg12: memref<1x8x128xf32, #tpu.memory_space<vmem>>, %arg13: memref<4x8xf32, #tpu.memory_space<vmem>>, %arg14: memref<8x8xf32, #tpu.memory_space<vmem>>, %arg15: memref<6x8xf32, #tpu.memory_space<vmem>>) attributes {dimension_semantics = [#tpu.dimension_semantics<parallel>, #tpu.dimension_semantics<arbitrary>], iteration_bounds = array<i64: 2, 2>, scalar_prefetch = 0 : i64, scratch_operands = 3 : i64, tpu.core_type = #tpu.core_type<tc>, window_params = [{transform_indices = @transform_0, window_bounds = array<i64: 1, 8, 3>}, {transform_indices = @transform_1, window_bounds = array<i64: 1, 4, 128>}, {transform_indices = @transform_2, window_bounds = array<i64: 1, 128>}, {transform_indices = @transform_3, window_bounds = array<i64: 1, 128>}, {transform_indices = @transform_4, window_bounds = array<i64: 1, 8, 64>}, {transform_indices = @transform_5, window_bounds = array<i64: 1, 64>}, {transform_indices = @transform_6, window_bounds = array<i64: 1, 64>}, {transform_indices = @transform_7, window_bounds = array<i64: 1, 6, 128>}, {transform_indices = @transform_8, window_bounds = array<i64: 1, 128>}, {transform_indices = @transform_9, window_bounds = array<i64: 1, 128>}, {transform_indices = @transform_10, window_bounds = array<i64: 1, 8, 128>}]} {
    %c0 = arith.constant 0 : index
    %c0_0 = arith.constant 0 : index
    %c0_1 = arith.constant 0 : index
    %0 = vector.load %arg2[%c0, %c0_0, %c0_1] : memref<1x8x3xf32, #tpu.memory_space<vmem>>, vector<1x8x3xf32>
    %1 = vector.shape_cast %0 : vector<1x8x3xf32> to vector<8x3xf32>
    %c0_i32 = arith.constant 0 : i32
    %2 = arith.cmpi eq, %arg1, %c0_i32 : i32
    %3 = arith.extui %2 : i1 to i32
    %c0_i32_2 = arith.constant 0 : i32
    %4 = arith.cmpi ne, %3, %c0_i32_2 : i32
    scf.if %4 {
      %c0_75 = arith.constant 0 : index
      %c0_76 = arith.constant 0 : index
      %c0_77 = arith.constant 0 : index
      %144 = vector.load %arg12[%c0_75, %c0_76, %c0_77] : memref<1x8x128xf32, #tpu.memory_space<vmem>>, vector<1x8x3xf32>
      %145 = vector.shape_cast %144 : vector<1x8x3xf32> to vector<8x3xf32>
      %146 = vector.shape_cast %1 : vector<8x3xf32> to vector<1x8x3xf32>
      tpu.vector_store %arg12[%c0_75, %c0_76, %c0_77], %146 {strides = array<i32>} : memref<1x8x128xf32, #tpu.memory_space<vmem>>, vector<1x8x3xf32>,
    } else {
    }
    %5 = vector.extract_strided_slice %1 {offsets = [0, 0], sizes = [8, 1], strides = [1, 1]} : vector<8x3xf32> to vector<8x1xf32>
    %cst = arith.constant 0.000000e+00 : f32
    %6 = vector.broadcast %cst : f32 to vector<8x1xf32>
    %7 = arith.addf %5, %6 : vector<8x1xf32>
    %8 = vector.extract_strided_slice %1 {offsets = [0, 1], sizes = [8, 1], strides = [1, 1]} : vector<8x3xf32> to vector<8x1xf32>
    %cst_3 = arith.constant 0.000000e+00 : f32
    %9 = vector.broadcast %cst_3 : f32 to vector<8x1xf32>
    %10 = arith.addf %8, %9 : vector<8x1xf32>
    %cst_4 = arith.constant -2.480000e+02 : f32
    %11 = vector.broadcast %cst_4 : f32 to vector<8x1xf32>
    %12 = arith.mulf %11, %7 : vector<8x1xf32>
    %cst_5 = arith.constant 1.115000e+02 : f32
    %13 = vector.broadcast %cst_5 : f32 to vector<8x1xf32>
    %14 = arith.divf %12, %13 : vector<8x1xf32>
    %cst_6 = arith.constant 0.000000e+00 : f32
    %15 = vector.broadcast %cst_6 : f32 to vector<8x1xf32>
    %16 = arith.addf %14, %15 : vector<8x1xf32>
    %cst_7 = arith.constant -1.000000e+00 : f32
    %cst_8 = arith.constant 1.000000e+00 : f32
    %17 = vector.broadcast %cst_7 : f32 to vector<8x1xf32>
    %18 = arith.maximumf %17, %16 : vector<8x1xf32>
    %19 = vector.broadcast %cst_8 : f32 to vector<8x1xf32>
    %20 = arith.minimumf %19, %18 : vector<8x1xf32>
    %cst_9 = arith.constant 2.480000e+02 : f32
    %21 = vector.broadcast %cst_9 : f32 to vector<8x1xf32>
    %22 = arith.mulf %21, %10 : vector<8x1xf32>
    %cst_10 = arith.constant 1.115000e+02 : f32
    %23 = vector.broadcast %cst_10 : f32 to vector<8x1xf32>
    %24 = arith.divf %22, %23 : vector<8x1xf32>
    %cst_11 = arith.constant 0.000000e+00 : f32
    %25 = vector.broadcast %cst_11 : f32 to vector<8x1xf32>
    %26 = arith.addf %24, %25 : vector<8x1xf32>
    %cst_12 = arith.constant -1.000000e+00 : f32
    %cst_13 = arith.constant 1.000000e+00 : f32
    %27 = vector.broadcast %cst_12 : f32 to vector<8x1xf32>
    %28 = arith.maximumf %27, %26 : vector<8x1xf32>
    %29 = vector.broadcast %cst_13 : f32 to vector<8x1xf32>
    %30 = arith.minimumf %29, %28 : vector<8x1xf32>
    %cst_14 = arith.constant 1.000000e+00 : f32
    %31 = vector.broadcast %cst_14 : f32 to vector<8x1xf32>
    %32 = arith.addf %20, %31 : vector<8x1xf32>
    %cst_15 = arith.constant 1.600000e+01 : f32
    %33 = vector.broadcast %cst_15 : f32 to vector<8x1xf32>
    %34 = arith.mulf %32, %33 : vector<8x1xf32>
    %cst_16 = arith.constant 1.000000e+00 : f32
    %35 = vector.broadcast %cst_16 : f32 to vector<8x1xf32>
    %36 = arith.subf %34, %35 : vector<8x1xf32>
    %cst_17 = arith.constant 5.000000e-01 : f32
    %37 = vector.broadcast %cst_17 : f32 to vector<8x1xf32>
    %38 = arith.mulf %36, %37 : vector<8x1xf32>
    %cst_18 = arith.constant 1.000000e+00 : f32
    %39 = vector.broadcast %cst_18 : f32 to vector<8x1xf32>
    %40 = arith.addf %30, %39 : vector<8x1xf32>
    %cst_19 = arith.constant 1.600000e+01 : f32
    %41 = vector.broadcast %cst_19 : f32 to vector<8x1xf32>
    %42 = arith.mulf %40, %41 : vector<8x1xf32>
    %cst_20 = arith.constant 1.000000e+00 : f32
    %43 = vector.broadcast %cst_20 : f32 to vector<8x1xf32>
    %44 = arith.subf %42, %43 : vector<8x1xf32>
    %cst_21 = arith.constant 5.000000e-01 : f32
    %45 = vector.broadcast %cst_21 : f32 to vector<8x1xf32>
    %46 = arith.mulf %44, %45 : vector<8x1xf32>
    %c0_22 = arith.constant 0 : index
    %c0_23 = arith.constant 0 : index
    %47 = vector.load %arg4[%c0_22, %c0_23] : memref<1x128xf32, #tpu.memory_space<vmem>>, vector<1x128xf32>
    %c0_24 = arith.constant 0 : index
    %c0_25 = arith.constant 0 : index
    %48 = vector.load %arg5[%c0_24, %c0_25] : memref<1x128xf32, #tpu.memory_space<vmem>>, vector<1x128xf32>
    %49 = vector.broadcast %47 : vector<1x128xf32> to vector<8x128xf32>
    %50 = vector.broadcast %38 : vector<8x1xf32> to vector<8x128xf32>
    %51 = arith.subf %49, %50 : vector<8x128xf32>
    %52 = vector.broadcast %48 : vector<1x128xf32> to vector<8x128xf32>
    %53 = vector.broadcast %46 : vector<8x1xf32> to vector<8x128xf32>
    %54 = arith.subf %52, %53 : vector<8x128xf32>
    %55 = math.absf %51 : vector<8x128xf32>
    %cst_26 = arith.constant 1.000000e+00 : f32
    %56 = vector.broadcast %cst_26 : f32 to vector<8x128xf32>
    %57 = arith.subf %56, %55 : vector<8x128xf32>
    %cst_27 = arith.constant 0.000000e+00 : f32
    %58 = vector.broadcast %cst_27 : f32 to vector<8x128xf32>
    %59 = arith.maximumf %57, %58 : vector<8x128xf32>
    %60 = math.absf %54 : vector<8x128xf32>
    %cst_28 = arith.constant 1.000000e+00 : f32
    %61 = vector.broadcast %cst_28 : f32 to vector<8x128xf32>
    %62 = arith.subf %61, %60 : vector<8x128xf32>
    %cst_29 = arith.constant 0.000000e+00 : f32
    %63 = vector.broadcast %cst_29 : f32 to vector<8x128xf32>
    %64 = arith.maximumf %62, %63 : vector<8x128xf32>
    %65 = arith.mulf %59, %64 : vector<8x128xf32>
    %c0_30 = arith.constant 0 : index
    %c0_31 = arith.constant 0 : index
    %c0_32 = arith.constant 0 : index
    %66 = vector.load %arg3[%c0_30, %c0_31, %c0_32] : memref<1x4x128xf32, #tpu.memory_space<vmem>>, vector<1x4x128xf32>
    %67 = vector.shape_cast %66 : vector<1x4x128xf32> to vector<4x128xf32>
    %cst_33 = arith.constant dense<0.000000e+00> : vector<4x8xf32>
    %68 = tpu.matmul %67, %65, %cst_33 {dimension_numbers = #tpu.dot_dimension_numbers<[1], [1], [0], [0], [0, 0, 1, 0], [], []>} : vector<4x128xf32>, vector<8x128xf32>, vector<4x8xf32> -> vector<4x8xf32>
    %c0_i32_34 = arith.constant 0 : i32
    %69 = arith.cmpi eq, %arg1, %c0_i32_34 : i32
    %70 = arith.extui %69 : i1 to i32
    %c0_i32_35 = arith.constant 0 : i32
    %71 = arith.cmpi ne, %70, %c0_i32_35 : i32
    scf.if %71 {
      %c0_75 = arith.constant 0 : index
      %c0_76 = arith.constant 0 : index
      %144 = vector.load %arg13[%c0_75, %c0_76] : memref<4x8xf32, #tpu.memory_space<vmem>>, vector<4x8xf32>
      tpu.vector_store %arg13[%c0_75, %c0_76], %68 {strides = array<i32>} : memref<4x8xf32, #tpu.memory_space<vmem>>, vector<4x8xf32>,
    } else {
    }
    %c0_i32_36 = arith.constant 0 : i32
    %72 = arith.cmpi sgt, %arg1, %c0_i32_36 : i32
    %73 = arith.extui %72 : i1 to i32
    %c0_i32_37 = arith.constant 0 : i32
    %74 = arith.cmpi ne, %73, %c0_i32_37 : i32
    scf.if %74 {
      %c0_75 = arith.constant 0 : index
      %c0_76 = arith.constant 0 : index
      %144 = vector.load %arg13[%c0_75, %c0_76] : memref<4x8xf32, #tpu.memory_space<vmem>>, vector<4x8xf32>
      %145 = arith.addf %144, %68 : vector<4x8xf32>
      %c0_77 = arith.constant 0 : index
      %c0_78 = arith.constant 0 : index
      %146 = vector.load %arg13[%c0_77, %c0_78] : memref<4x8xf32, #tpu.memory_space<vmem>>, vector<4x8xf32>
      tpu.vector_store %arg13[%c0_77, %c0_78], %145 {strides = array<i32>} : memref<4x8xf32, #tpu.memory_space<vmem>>, vector<4x8xf32>,
    } else {
    }
    %c1_i32 = arith.constant 1 : i32
    %75 = arith.cmpi eq, %arg1, %c1_i32 : i32
    %76 = arith.extui %75 : i1 to i32
    %c0_i32_38 = arith.constant 0 : i32
    %77 = arith.cmpi ne, %76, %c0_i32_38 : i32
    scf.if %77 {
      %c0_75 = arith.constant 0 : index
      %c0_76 = arith.constant 0 : index
      %144 = vector.load %arg13[%c0_75, %c0_76] : memref<4x8xf32, #tpu.memory_space<vmem>>, vector<4x8xf32>
      %145 = tpu.transpose %144, [1, 0] : vector<4x8xf32> -> vector<8x4xf32>
      %c0_77 = arith.constant 0 : index
      %c0_78 = arith.constant 0 : index
      %c3 = arith.constant 3 : index
      %146 = vector.load %arg12[%c0_77, %c0_78, %c3] : memref<1x8x128xf32, #tpu.memory_space<vmem>>, vector<1x8x4xf32>
      %147 = vector.shape_cast %146 : vector<1x8x4xf32> to vector<8x4xf32>
      %148 = vector.shape_cast %145 : vector<8x4xf32> to vector<1x8x4xf32>
      tpu.vector_store %arg12[%c0_77, %c0_78, %c3], %148 {strides = array<i32>} : memref<1x8x128xf32, #tpu.memory_space<vmem>>, vector<1x8x4xf32>,
    } else {
    }
    %cst_39 = arith.constant 1.000000e+00 : f32
    %78 = vector.broadcast %cst_39 : f32 to vector<8x1xf32>
    %79 = arith.addf %20, %78 : vector<8x1xf32>
    %cst_40 = arith.constant 8.000000e+00 : f32
    %80 = vector.broadcast %cst_40 : f32 to vector<8x1xf32>
    %81 = arith.mulf %79, %80 : vector<8x1xf32>
    %cst_41 = arith.constant 1.000000e+00 : f32
    %82 = vector.broadcast %cst_41 : f32 to vector<8x1xf32>
    %83 = arith.subf %81, %82 : vector<8x1xf32>
    %cst_42 = arith.constant 5.000000e-01 : f32
    %84 = vector.broadcast %cst_42 : f32 to vector<8x1xf32>
    %85 = arith.mulf %83, %84 : vector<8x1xf32>
    %cst_43 = arith.constant 1.000000e+00 : f32
    %86 = vector.broadcast %cst_43 : f32 to vector<8x1xf32>
    %87 = arith.addf %30, %86 : vector<8x1xf32>
    %cst_44 = arith.constant 8.000000e+00 : f32
    %88 = vector.broadcast %cst_44 : f32 to vector<8x1xf32>
    %89 = arith.mulf %87, %88 : vector<8x1xf32>
    %cst_45 = arith.constant 1.000000e+00 : f32
    %90 = vector.broadcast %cst_45 : f32 to vector<8x1xf32>
    %91 = arith.subf %89, %90 : vector<8x1xf32>
    %cst_46 = arith.constant 5.000000e-01 : f32
    %92 = vector.broadcast %cst_46 : f32 to vector<8x1xf32>
    %93 = arith.mulf %91, %92 : vector<8x1xf32>
    %c1_i32_47 = arith.constant 1 : i32
    %94 = arith.cmpi slt, %arg1, %c1_i32_47 : i32
    %95 = arith.extui %94 : i1 to i32
    %c0_i32_48 = arith.constant 0 : i32
    %96 = arith.cmpi ne, %95, %c0_i32_48 : i32
    scf.if %96 {
      %c0_75 = arith.constant 0 : index
      %c0_76 = arith.constant 0 : index
      %144 = vector.load %arg7[%c0_75, %c0_76] : memref<1x64xf32, #tpu.memory_space<vmem>>, vector<1x64xf32>
      %c0_77 = arith.constant 0 : index
      %c0_78 = arith.constant 0 : index
      %145 = vector.load %arg8[%c0_77, %c0_78] : memref<1x64xf32, #tpu.memory_space<vmem>>, vector<1x64xf32>
      %146 = vector.broadcast %144 : vector<1x64xf32> to vector<8x64xf32>
      %147 = vector.broadcast %85 : vector<8x1xf32> to vector<8x64xf32>
      %148 = arith.subf %146, %147 : vector<8x64xf32>
      %149 = vector.broadcast %145 : vector<1x64xf32> to vector<8x64xf32>
      %150 = vector.broadcast %93 : vector<8x1xf32> to vector<8x64xf32>
      %151 = arith.subf %149, %150 : vector<8x64xf32>
      %152 = math.absf %148 : vector<8x64xf32>
      %cst_79 = arith.constant 1.000000e+00 : f32
      %153 = vector.broadcast %cst_79 : f32 to vector<8x64xf32>
      %154 = arith.subf %153, %152 : vector<8x64xf32>
      %cst_80 = arith.constant 0.000000e+00 : f32
      %155 = vector.broadcast %cst_80 : f32 to vector<8x64xf32>
      %156 = arith.maximumf %154, %155 : vector<8x64xf32>
      %157 = math.absf %151 : vector<8x64xf32>
      %cst_81 = arith.constant 1.000000e+00 : f32
      %158 = vector.broadcast %cst_81 : f32 to vector<8x64xf32>
      %159 = arith.subf %158, %157 : vector<8x64xf32>
      %cst_82 = arith.constant 0.000000e+00 : f32
      %160 = vector.broadcast %cst_82 : f32 to vector<8x64xf32>
      %161 = arith.maximumf %159, %160 : vector<8x64xf32>
      %162 = arith.mulf %156, %161 : vector<8x64xf32>
      %c0_83 = arith.constant 0 : index
      %c0_84 = arith.constant 0 : index
      %c0_85 = arith.constant 0 : index
      %163 = vector.load %arg6[%c0_83, %c0_84, %c0_85] : memref<1x8x64xf32, #tpu.memory_space<vmem>>, vector<1x8x64xf32>
      %164 = vector.shape_cast %163 : vector<1x8x64xf32> to vector<8x64xf32>
      %cst_86 = arith.constant dense<0.000000e+00> : vector<8x8xf32>
      %165 = tpu.matmul %164, %162, %cst_86 {dimension_numbers = #tpu.dot_dimension_numbers<[1], [1], [0], [0], [0, 0, 1, 0], [], []>} : vector<8x64xf32>, vector<8x64xf32>, vector<8x8xf32> -> vector<8x8xf32>
      %c0_i32_87 = arith.constant 0 : i32
      %166 = arith.cmpi eq, %arg1, %c0_i32_87 : i32
      %167 = arith.extui %166 : i1 to i32
      %c0_i32_88 = arith.constant 0 : i32
      %168 = arith.cmpi ne, %167, %c0_i32_88 : i32
      scf.if %168 {
        %c0_93 = arith.constant 0 : index
        %c0_94 = arith.constant 0 : index
        %175 = vector.load %arg14[%c0_93, %c0_94] : memref<8x8xf32, #tpu.memory_space<vmem>>, vector<8x8xf32>
        tpu.vector_store %arg14[%c0_93, %c0_94], %165 {strides = array<i32>} : memref<8x8xf32, #tpu.memory_space<vmem>>, vector<8x8xf32>,
      } else {
      }
      %c0_i32_89 = arith.constant 0 : i32
      %169 = arith.cmpi sgt, %arg1, %c0_i32_89 : i32
      %170 = arith.extui %169 : i1 to i32
      %c0_i32_90 = arith.constant 0 : i32
      %171 = arith.cmpi ne, %170, %c0_i32_90 : i32
      scf.if %171 {
        %c0_93 = arith.constant 0 : index
        %c0_94 = arith.constant 0 : index
        %175 = vector.load %arg14[%c0_93, %c0_94] : memref<8x8xf32, #tpu.memory_space<vmem>>, vector<8x8xf32>
        %176 = arith.addf %175, %165 : vector<8x8xf32>
        %c0_95 = arith.constant 0 : index
        %c0_96 = arith.constant 0 : index
        %177 = vector.load %arg14[%c0_95, %c0_96] : memref<8x8xf32, #tpu.memory_space<vmem>>, vector<8x8xf32>
        tpu.vector_store %arg14[%c0_95, %c0_96], %176 {strides = array<i32>} : memref<8x8xf32, #tpu.memory_space<vmem>>, vector<8x8xf32>,
      } else {
      }
      %c0_i32_91 = arith.constant 0 : i32
      %172 = arith.cmpi eq, %arg1, %c0_i32_91 : i32
      %173 = arith.extui %172 : i1 to i32
      %c0_i32_92 = arith.constant 0 : i32
      %174 = arith.cmpi ne, %173, %c0_i32_92 : i32
      scf.if %174 {
        %c0_93 = arith.constant 0 : index
        %c0_94 = arith.constant 0 : index
        %175 = vector.load %arg14[%c0_93, %c0_94] : memref<8x8xf32, #tpu.memory_space<vmem>>, vector<8x8xf32>
        %176 = tpu.transpose %175, [1, 0] : vector<8x8xf32> -> vector<8x8xf32>
        %c0_95 = arith.constant 0 : index
        %c0_96 = arith.constant 0 : index
        %c7 = arith.constant 7 : index
        %177 = vector.load %arg12[%c0_95, %c0_96, %c7] : memref<1x8x128xf32, #tpu.memory_space<vmem>>, vector<1x8x8xf32>
        %178 = vector.shape_cast %177 : vector<1x8x8xf32> to vector<8x8xf32>
        %179 = vector.shape_cast %176 : vector<8x8xf32> to vector<1x8x8xf32>
        tpu.vector_store %arg12[%c0_95, %c0_96, %c7], %179 {strides = array<i32>} : memref<1x8x128xf32, #tpu.memory_space<vmem>>, vector<1x8x8xf32>,
      } else {
      }
    } else {
    }
    %cst_49 = arith.constant 1.000000e+00 : f32
    %97 = vector.broadcast %cst_49 : f32 to vector<8x1xf32>
    %98 = arith.addf %20, %97 : vector<8x1xf32>
    %cst_50 = arith.constant 1.200000e+01 : f32
    %99 = vector.broadcast %cst_50 : f32 to vector<8x1xf32>
    %100 = arith.mulf %98, %99 : vector<8x1xf32>
    %cst_51 = arith.constant 1.000000e+00 : f32
    %101 = vector.broadcast %cst_51 : f32 to vector<8x1xf32>
    %102 = arith.subf %100, %101 : vector<8x1xf32>
    %cst_52 = arith.constant 5.000000e-01 : f32
    %103 = vector.broadcast %cst_52 : f32 to vector<8x1xf32>
    %104 = arith.mulf %102, %103 : vector<8x1xf32>
    %cst_53 = arith.constant 1.000000e+00 : f32
    %105 = vector.broadcast %cst_53 : f32 to vector<8x1xf32>
    %106 = arith.addf %30, %105 : vector<8x1xf32>
    %cst_54 = arith.constant 1.200000e+01 : f32
    %107 = vector.broadcast %cst_54 : f32 to vector<8x1xf32>
    %108 = arith.mulf %106, %107 : vector<8x1xf32>
    %cst_55 = arith.constant 1.000000e+00 : f32
    %109 = vector.broadcast %cst_55 : f32 to vector<8x1xf32>
    %110 = arith.subf %108, %109 : vector<8x1xf32>
    %cst_56 = arith.constant 5.000000e-01 : f32
    %111 = vector.broadcast %cst_56 : f32 to vector<8x1xf32>
    %112 = arith.mulf %110, %111 : vector<8x1xf32>
    %c0_57 = arith.constant 0 : index
    %c0_58 = arith.constant 0 : index
    %113 = vector.load %arg10[%c0_57, %c0_58] : memref<1x128xf32, #tpu.memory_space<vmem>>, vector<1x128xf32>
    %c0_59 = arith.constant 0 : index
    %c0_60 = arith.constant 0 : index
    %114 = vector.load %arg11[%c0_59, %c0_60] : memref<1x128xf32, #tpu.memory_space<vmem>>, vector<1x128xf32>
    %115 = vector.broadcast %113 : vector<1x128xf32> to vector<8x128xf32>
    %116 = vector.broadcast %104 : vector<8x1xf32> to vector<8x128xf32>
    %117 = arith.subf %115, %116 : vector<8x128xf32>
    %118 = vector.broadcast %114 : vector<1x128xf32> to vector<8x128xf32>
    %119 = vector.broadcast %112 : vector<8x1xf32> to vector<8x128xf32>
    %120 = arith.subf %118, %119 : vector<8x128xf32>
    %121 = math.absf %117 : vector<8x128xf32>
    %cst_61 = arith.constant 1.000000e+00 : f32
    %122 = vector.broadcast %cst_61 : f32 to vector<8x128xf32>
    %123 = arith.subf %122, %121 : vector<8x128xf32>
    %cst_62 = arith.constant 0.000000e+00 : f32
    %124 = vector.broadcast %cst_62 : f32 to vector<8x128xf32>
    %125 = arith.maximumf %123, %124 : vector<8x128xf32>
    %126 = math.absf %120 : vector<8x128xf32>
    %cst_63 = arith.constant 1.000000e+00 : f32
    %127 = vector.broadcast %cst_63 : f32 to vector<8x128xf32>
    %128 = arith.subf %127, %126 : vector<8x128xf32>
    %cst_64 = arith.constant 0.000000e+00 : f32
    %129 = vector.broadcast %cst_64 : f32 to vector<8x128xf32>
    %130 = arith.maximumf %128, %129 : vector<8x128xf32>
    %131 = arith.mulf %125, %130 : vector<8x128xf32>
    %c0_65 = arith.constant 0 : index
    %c0_66 = arith.constant 0 : index
    %c0_67 = arith.constant 0 : index
    %132 = vector.load %arg9[%c0_65, %c0_66, %c0_67] : memref<1x6x128xf32, #tpu.memory_space<vmem>>, vector<1x6x128xf32>
    %133 = vector.shape_cast %132 : vector<1x6x128xf32> to vector<6x128xf32>
    %cst_68 = arith.constant dense<0.000000e+00> : vector<6x8xf32>
    %134 = tpu.matmul %133, %131, %cst_68 {dimension_numbers = #tpu.dot_dimension_numbers<[1], [1], [0], [0], [0, 0, 1, 0], [], []>} : vector<6x128xf32>, vector<8x128xf32>, vector<6x8xf32> -> vector<6x8xf32>
    %c0_i32_69 = arith.constant 0 : i32
    %135 = arith.cmpi eq, %arg1, %c0_i32_69 : i32
    %136 = arith.extui %135 : i1 to i32
    %c0_i32_70 = arith.constant 0 : i32
    %137 = arith.cmpi ne, %136, %c0_i32_70 : i32
    scf.if %137 {
      %c0_75 = arith.constant 0 : index
      %c0_76 = arith.constant 0 : index
      %144 = vector.load %arg15[%c0_75, %c0_76] : memref<6x8xf32, #tpu.memory_space<vmem>>, vector<6x8xf32>
      tpu.vector_store %arg15[%c0_75, %c0_76], %134 {strides = array<i32>} : memref<6x8xf32, #tpu.memory_space<vmem>>, vector<6x8xf32>,
    } else {
    }
    %c0_i32_71 = arith.constant 0 : i32
    %138 = arith.cmpi sgt, %arg1, %c0_i32_71 : i32
    %139 = arith.extui %138 : i1 to i32
    %c0_i32_72 = arith.constant 0 : i32
    %140 = arith.cmpi ne, %139, %c0_i32_72 : i32
    scf.if %140 {
      %c0_75 = arith.constant 0 : index
      %c0_76 = arith.constant 0 : index
      %144 = vector.load %arg15[%c0_75, %c0_76] : memref<6x8xf32, #tpu.memory_space<vmem>>, vector<6x8xf32>
      %145 = arith.addf %144, %134 : vector<6x8xf32>
      %c0_77 = arith.constant 0 : index
      %c0_78 = arith.constant 0 : index
      %146 = vector.load %arg15[%c0_77, %c0_78] : memref<6x8xf32, #tpu.memory_space<vmem>>, vector<6x8xf32>
      tpu.vector_store %arg15[%c0_77, %c0_78], %145 {strides = array<i32>} : memref<6x8xf32, #tpu.memory_space<vmem>>, vector<6x8xf32>,
    } else {
    }
    %c1_i32_73 = arith.constant 1 : i32
    %141 = arith.cmpi eq, %arg1, %c1_i32_73 : i32
    %142 = arith.extui %141 : i1 to i32
    %c0_i32_74 = arith.constant 0 : i32
    %143 = arith.cmpi ne, %142, %c0_i32_74 : i32
    scf.if %143 {
      %c0_75 = arith.constant 0 : index
      %c0_76 = arith.constant 0 : index
      %144 = vector.load %arg15[%c0_75, %c0_76] : memref<6x8xf32, #tpu.memory_space<vmem>>, vector<6x8xf32>
      %145 = tpu.transpose %144, [1, 0] : vector<6x8xf32> -> vector<8x6xf32>
      %c0_77 = arith.constant 0 : index
      %c0_78 = arith.constant 0 : index
      %c15 = arith.constant 15 : index
      %146 = vector.load %arg12[%c0_77, %c0_78, %c15] : memref<1x8x128xf32, #tpu.memory_space<vmem>>, vector<1x8x6xf32>
      %147 = vector.shape_cast %146 : vector<1x8x6xf32> to vector<8x6xf32>
      %148 = vector.shape_cast %145 : vector<8x6xf32> to vector<1x8x6xf32>
      tpu.vector_store %arg12[%c0_77, %c0_78, %c15], %148 {strides = array<i32>} : memref<1x8x128xf32, #tpu.memory_space<vmem>>, vector<1x8x6xf32>,
    } else {
    }
    return
  }
  func.func @transform_0(%arg0: i32, %arg1: i32) -> (i32, i32, i32) {
    %c0_i32 = arith.constant 0 : i32
    %c0_i32_0 = arith.constant 0 : i32
    %c0_i32_1 = arith.constant 0 : i32
    return %arg0, %c0_i32, %c0_i32_0 : i32, i32, i32
  }
  func.func @transform_1(%arg0: i32, %arg1: i32) -> (i32, i32, i32) {
    %c1_i32 = arith.constant 1 : i32
    %0 = arith.minsi %arg1, %c1_i32 : i32
    %c0_i32 = arith.constant 0 : i32
    %c0_i32_0 = arith.constant 0 : i32
    return %arg0, %c0_i32, %0 : i32, i32, i32
  }
  func.func @transform_2(%arg0: i32, %arg1: i32) -> (i32, i32) {
    %c1_i32 = arith.constant 1 : i32
    %0 = arith.minsi %arg1, %c1_i32 : i32
    %c0_i32 = arith.constant 0 : i32
    %c0_i32_0 = arith.constant 0 : i32
    return %c0_i32, %0 : i32, i32
  }
  func.func @transform_3(%arg0: i32, %arg1: i32) -> (i32, i32) {
    %c1_i32 = arith.constant 1 : i32
    %0 = arith.minsi %arg1, %c1_i32 : i32
    %c0_i32 = arith.constant 0 : i32
    %c0_i32_0 = arith.constant 0 : i32
    return %c0_i32, %0 : i32, i32
  }
  func.func @transform_4(%arg0: i32, %arg1: i32) -> (i32, i32, i32) {
    %c0_i32 = arith.constant 0 : i32
    %0 = arith.minsi %arg1, %c0_i32 : i32
    %c0_i32_0 = arith.constant 0 : i32
    %c0_i32_1 = arith.constant 0 : i32
    return %arg0, %c0_i32_0, %0 : i32, i32, i32
  }
  func.func @transform_5(%arg0: i32, %arg1: i32) -> (i32, i32) {
    %c0_i32 = arith.constant 0 : i32
    %0 = arith.minsi %arg1, %c0_i32 : i32
    %c0_i32_0 = arith.constant 0 : i32
    %c0_i32_1 = arith.constant 0 : i32
    return %c0_i32_0, %0 : i32, i32
  }
  func.func @transform_6(%arg0: i32, %arg1: i32) -> (i32, i32) {
    %c0_i32 = arith.constant 0 : i32
    %0 = arith.minsi %arg1, %c0_i32 : i32
    %c0_i32_0 = arith.constant 0 : i32
    %c0_i32_1 = arith.constant 0 : i32
    return %c0_i32_0, %0 : i32, i32
  }
  func.func @transform_7(%arg0: i32, %arg1: i32) -> (i32, i32, i32) {
    %c1_i32 = arith.constant 1 : i32
    %0 = arith.minsi %arg1, %c1_i32 : i32
    %c0_i32 = arith.constant 0 : i32
    %c0_i32_0 = arith.constant 0 : i32
    return %arg0, %c0_i32, %0 : i32, i32, i32
  }
  func.func @transform_8(%arg0: i32, %arg1: i32) -> (i32, i32) {
    %c1_i32 = arith.constant 1 : i32
    %0 = arith.minsi %arg1, %c1_i32 : i32
    %c0_i32 = arith.constant 0 : i32
    %c0_i32_0 = arith.constant 0 : i32
    return %c0_i32, %0 : i32, i32
  }
  func.func @transform_9(%arg0: i32, %arg1: i32) -> (i32, i32) {
    %c1_i32 = arith.constant 1 : i32
    %0 = arith.minsi %arg1, %c1_i32 : i32
    %c0_i32 = arith.constant 0 : i32
    %c0_i32_0 = arith.constant 0 : i32
    return %c0_i32, %0 : i32, i32
  }
  func.func @transform_10(%arg0: i32, %arg1: i32) -> (i32, i32, i32) {
    %c0_i32 = arith.constant 0 : i32
    %c0_i32_0 = arith.constant 0 : i32
    %c0_i32_1 = arith.constant 0 : i32
    return %arg0, %c0_i32, %c0_i32_0 : i32, i32, i32
  }
}

</mosaic_0001>

<bundles_post_ra>
// kernel: tpu_custom_call.1
= control target key start
LH: loop header
LB: loop body
LE: loop exit
PB: predicated region body
PF: predicated region fallthrough
CT: control target
= control target key end

     0   :  { %s1990_s0 = inlined_call_operand.vmem [shape: f32[2,8,3], index: 0, kind: input, shape index: {}]   ;;  %s1991_s1 = inlined_call_operand.vmem [shape: f32[2,4,256], index: 1, kind: input, shape index: {}]   ;;  %s1992_s2 = inlined_call_operand.vmem [shape: f32[1,256], index: 2, kind: input, shape index: {}]   ;;  %s1993_s3 = inlined_call_operand.vmem [shape: f32[1,256], index: 3, kind: input, shape index: {}]   ;;  %s1994_s4 = inlined_call_operand.vmem [shape: f32[2,8,64], index: 4, kind: input, shape index: {}]   ;;  %s1995_s5 = inlined_call_operand.vmem [shape: f32[1,64], index: 5, kind: input, shape index: {}]   ;;  %s1996_s6 = inlined_call_operand.vmem [shape: f32[1,64], index: 6, kind: input, shape index: {}]   ;;  %s1997_s7 = inlined_call_operand.vmem [shape: f32[2,6,256], index: 7, kind: input, shape index: {}]   ;;  %s1998_s8 = inlined_call_operand.vmem [shape: f32[1,256], index: 8, kind: input, shape index: {}]   ;;  %s1999_s9 = inlined_call_operand.vmem [shape: f32[1,256], index: 9, kind: input, shape index: {}]   ;;  %s2000_s10 = inlined_call_operand.hbm [shape: f32[2,8,128], index: 10, kind: output, shape index: {}]  }
   0x1   :  { %2014 = sst [smem:[#allocation19_spill]] %s1990_s0 }
   0x2   :  { %2015 = sst [smem:[#allocation20_spill]] %s1991_s1 }
   0x3   :  { %2016 = sst [smem:[#allocation21_spill]] %s1997_s7 }
   0x4   :  { %2017 = sst [smem:[#allocation22_spill]] %s2000_s10 }
   0x5   :  { %15 = vsyncpa [#allocation6], 0 }
   0x6   :  { %17 = vsyncpa [#allocation6 + $0x1], 0  ;;  %s1725_s13 = smov 0   ;;  %s1727_s14 = smov 0  }
   0x7   :  { %s1729_s15 = smov 0   ;;  %s1731_s16 = smov 0  }
   0x8   :  { %s1733_s17 = smov 0   ;;  %s1735_s18 = smov 0  }
   0x9   :  { %s1737_s19 = smov 0   ;;  %s1739_s20 = smov 0  }
   0xa LB: > { %2018 = sst [smem:[#allocation8_spill]] %s1628_s13  ;;  %s1382_s21 = sadd.s32 4294967295, %s1656_s20   ;;  %s1656_s20 = sphi %s1739_s20, %s23_s20   ;;  %s1652_s19 = sphi %s1737_s19, %s2050_s19   ;;  %s1648_s18 = sphi %s1735_s18, %s2049_s18   ;;  %s1644_s17 = sphi %s1733_s17, %s2048_s17   ;;  %s1640_s16 = sphi %s1731_s16, %s2047_s16   ;;  %s1636_s15 = sphi %s1729_s15, %s2046_s15   ;;  %s1632_s14 = sphi %s1727_s14, %s2045_s14   ;;  %s1628_s13 = sphi %s1725_s13, %s2044_s13  }
   0xb   : > { %2019 = sst [smem:[#allocation9_spill]] %s1632_s14  ;;  %s1383_s22 = sadd.s32 4294967294, %s1656_s20  }
   0xc   : > { %2020 = sst [smem:[#allocation10_spill]] %s1636_s15  ;;  %s32_s23 = sadd.s32 1, %s1648_s18 }
   0xd   : > { %2021 = sst [smem:[#allocation11_spill]] %s1648_s18  ;;  %p33_p0 = scmp.ge.s32.totalorder %s32_s23, 2 }
   0xe   : > { %2022 = sst [smem:[#allocation12_spill]] %s1652_s19  ;;  %s35_s24 = sadd.s32 1, %s1652_s19 }
   0xf   : > { %2023 = sst [smem:[#allocation13_spill]] %s1656_s20  ;;  %p354_p1 = scmp.ne.s32.totalorder %s1636_s15, %s1632_s14 }
  0x10   : > { %p355_p2 = scmp.eq.s32.totalorder %s1382_s21, 3  ;;  %s2052_s23 = smov (%p33_p0, %s32_s23), 0 }
  0x11   : > { %2024 = sst [smem:[#allocation14_spill]] %s2052_s23  ;;  %s2054_s24 = smov (!%p33_p0, %s35_s24), %s1652_s19 }
  0x12   : > { %p1774_p3 = por %p355_p2, %p354_p1  ;;  %p360_p4 = scmp.ne.s32.totalorder %s1632_s14, %s1628_s13 }
  0x13   : > { %p37_p5 = scmp.ge.s32.totalorder %s2054_s24, 2  ;;  %p361_p6 = scmp.eq.s32.totalorder %s1383_s22, 3 }
  0x14   : > { %s2025_s25 = scalar_select %p1774_p3, 1, 0 }
  0x15   : > { %p1386_p7 = scmp.ge.s32.totalorder %s1656_s20, 1  ;;  %p490_p8 = scmp.lt.s32.totalorder %s1656_s20, 5 }
  0x16   : > { %2026 = sst [smem:[#allocation15_spill]] %s2025_s25  ;;  %s2056_s24 = smov (%p37_p5, %s2054_s24), 0 }
  0x17   : > { %2027 = sst [smem:[#allocation16_spill]] %s2056_s24  ;;  %p1784_p9 = por %p361_p6, %p360_p4 }
  0x18   : > { %p491_p10 = pnand %p1386_p7, %p490_p8  ;;  %s341_s27 = ssub.s32 %s1652_s19, %s2056_s24 }
  0x19   : > { %s2028_s26 = scalar_select %p1784_p9, 1, 0 }
  0x1a   : > { %s344_s28 = sadd.s32 1, %s1636_s15  ;;  %p342_p11 = scmp.eq.s32.totalorder %s341_s27, 0 }
  0x1b   : > { %2029 = sst [smem:[#allocation17_spill]] %s2028_s26  ;;  %494 = sbr.rel (%p491_p10) target bundleno = 1900 (0x76c), region = 60 }
  0x1c   : > { %s1792_s29 = scalar_select %p342_p11, %s1636_s15, %s344_s28  }
  0x1d   : > { %s2002_s30 = sand.u32 (!%p491_p10), 1, %s1632_s14   ;;  %p586_p12 = scmp.lt.s32.totalorder (!%p491_p10), %s1644_s17, 1 }
  0x1e   : > { %2030 = sst [smem:[#allocation18_spill]] %s1792_s29  ;;  %s1387_s11 = sshll.u32 (!%p491_p10), %s2002_s30, 3 }
  0x1f   : > { %p590_p13 = scmp.lt.s32.totalorder (!%p491_p10), %s1640_s16, 1  ;;  %p616_p0 = scmp.lt.s32.totalorder (!%p491_p10), %s1640_s16, 0 }
  0x20   : > { %s587_s12 = scalar_select %p586_p12, %s1644_s17, 1 }
  0x21   : > { %s591_s21 = scalar_select %p590_p13, %s1640_s16, 1 }
  0x22   : > { %s1388_s22 = sshll.u32 %s587_s12, 3  ;;  %s2031_s0 = sld [smem:[#allocation19_spill]] }
  0x23   : > { %s1392_s23 = sshll.u32 %s587_s12, 1  ;;  %s2058_s21 = smov (!%p590_p13, %s591_s21), 1 }
  0x24   : > { %s617_s30 = scalar_select %p616_p0, %s1640_s16, 0 }
  0x25   : > { %s597_s19 = sadd.s32 %s1392_s23, %s2058_s21  ;;  %s2032_s1 = sld [smem:[#allocation20_spill]] }
  0x26   : > { %s1393_s26 = sshll.u32 %s597_s19, 2  ;;  %s1414_s10 = sshll.u32 %s597_s19, 3 }
  0x27   : > { %s2060_s30 = smov (!%p616_p0, %s617_s30), 0  ;;  %s2033_s7 = sld [smem:[#allocation21_spill]] }
  0x28   : > { %s589_s24 = scalar_lea.vmem %s2031_s0, %s1388_s22  ;;  %s657_s27 = scalar_lea.vmem %s1998_s8, %s2058_s21 }
  0x29   : > { %v667_v0 = vld [vmem:[%s589_s24] sm:$0xff]  ;;  %s622_s22 = sadd.s32 %s2060_s30, %s587_s12  ;;  %s631_s19 = scalar_lea.vmem %s1995_s5, %s2060_s30 }
  0x2a   : > { %s1842_s28 = sshll.u32 %s622_s22, 3  ;;  %s638_s24 = scalar_lea.vmem %s1996_s6, %s2060_s30 }
  0x2b   : > { %s1822_s20 = scalar_lea.vmem %s2032_s1, %s1393_s26  ;;  %s664_s29 = scalar_lea.vmem %s1999_s9, %s2058_s21 }
  0x2c   : > { %s1856_s12 = scalar_lea.vmem [#allocation5], %s1387_s11  ;;  %p1421_p1 = scmp.ne.s32.totalorder %s1640_s16, 0 }
  0x2d   : > { %s1831_s18 = scalar_lea.vmem %s2033_s7, %s1414_s10  ;;  %s624_s10 = scalar_lea.vmem %s1994_s4, %s1842_s28 }
  0x2e   : > { %671 = sbr.rel (%p1421_p1) target bundleno = 53 (0x35), region = 64 }
  0x33   : > { %vm672_vm0 = vcmask 23552  }
  0x34   : > { %673 = vst.msk [vmem:[%s1856_s12] sm:$0xff] %vm672_vm0, %v667_v0 }
  0x35 PF: > { %v675_v1 = vmul.f32 -248.0, %v667_v0  ;;  %v681_v2 = vmul.f32 248.0, %v667_v0  ;;  %v1658_v3 = vmov 0   ;;  %v1659_v16 = vmov 1   ;;  %s2034_s14 = scalar_lea.vmem %s1992_s2, %s2058_s21  ;;  %s2035_s11 = scalar_lea.vmem %s1993_s3, %s2058_s21  ;;  %v727_v31 = vld [vmem:[%s1822_s20] sm:$0xf] }
  0x36   : > { %1558 = vset.pattern.permute.xlu0 %v1658_v3  ;;  %v1660_v17 = vmov 0.0   ;;  %vm1661_vm1 = vmmov 0   ;;  %v1426_v18 = vld [vmem:[%s2034_s14] ss:$0 sm:$0xff] }
  0x37   : > { %v677_v4 = vmul.f32 0.00896861, %v675_v1  ;;  %v682_v5 = vmul.f32 0.00896861, %v681_v2  ;;  %1458 = vmatprep.subr.mxu0 %v1660_v17  ;;  %1460 = vmatprep.mubr.msk.f32.mxu0 %vm1661_vm1, %v1660_v17  ;;  %v1427_v21 = vld [vmem:[%s2035_s11] ss:$0 sm:$0xff] }
  0x39   : > { %v1422_v6 = vclamps-f32 %v677_v4, 1.0  ;;  %v1423_v7 = vclamps-f32 %v682_v5, 1.0 }
  0x3b   : > { %v1863_v8 = vadd.f32 1.0, %v1422_v6  ;;  %v1865_v9 = vadd.f32 1.0, %v1423_v7 }
  0x3d   : > { %v687_v10 = vmul.f32 16.0, %v1863_v8  ;;  %v691_v11 = vmul.f32 16.0, %v1865_v9 }
  0x3f   : > { %v1424_v12 = vadd.f32 -1.0, %v687_v10  ;;  %v1425_v13 = vadd.f32 -1.0, %v691_v11 }
  0x41   : > { %v689_v14 = vmul.f32 0.5, %v1424_v12  ;;  %v693_v15 = vmul.f32 0.5, %v1425_v13 }
  0x43   : > { %704 = vperm.xlu0 %1558, %v689_v14  }
  0x47   : > { %1559 = vset.pattern.permute.xlu0 %v1659_v16 }
  0x48   : > { %716 = vperm.xlu0 %1559, %v693_v15  }
  0xbe   : > { %v705_v19 = vpop.permute.xlu0 %704 }
  0xbf   : > { %v707_v20 = vsub.f32 %v1426_v18, %v705_v19 }
  0xc1   : > { %v720_v22 = vand.u32 2147483647, %v707_v20 }
  0xc3   : > { %v717_v23 = vpop.permute.xlu0 %716  ;;  %v721_v25 = vsub.f32 1.0, %v720_v22 }
  0xc4   : > { %v719_v24 = vsub.f32 %v1427_v21, %v717_v23 }
  0xc5   : > { %v722_v28 = vmax.f32 %v721_v25, 0.0 }
  0xc6   : > { %v723_v26 = vand.u32 2147483647, %v719_v24 }
  0xc8   : > { %v724_v27 = vsub.f32 1.0, %v723_v26 }
  0xca   : > { %v725_v29 = vmax.f32 %v724_v27, 0.0 }
  0xcc   : > { %v726_v30 = vmul.f32 %v725_v29, %v722_v28 }
  0xce   : > { %1459 = vmatpush3.xpose.msra.mxu0 %v726_v30 }
  0xd1   : > { %1461 = vmatmul.mubr.f32.vlgmr.msra.gmra.mxu0 %v727_v31 }
 0x18f   : > { %800 = sbr.rel (%p1421_p1) target bundleno = 406 (0x196), region = 68 }
 0x191   : > { %v794_v32 = vpop.f32.mrf.mxu0 }
 0x193   : > { %v1462_v33 = vpop.f32.mrf.mxu0 }
 0x194   : > { %vm801_vm2 = vcmask 60416  }
 0x195   : > { %802 = vst.msk [vmem:[#allocation2] sm:$0xf] %vm801_vm2, %v794_v32 }
 0x196 PF: > { %p1429_p2 = scmp.le.s32.totalorder %s1640_s16, 0 }
 0x198   : > { %806 = sbr.rel (%p1429_p2) target bundleno = 417 (0x1a1), region = 72 }
 0x19d   : > { %v807_v34 = vld [vmem:[#allocation2] sm:$0xf]  ;;  %vm809_vm3 = vcmask 60416  }
 0x19e   : > { %v808_v35 = vadd.f32 %v807_v34, %v794_v32 }
 0x1a0   : > { %810 = vst.msk [vmem:[#allocation2] sm:$0xf] %vm809_vm3, %v808_v35 }
 0x1a1 PF: > { %p1430_p4 = scmp.ne.s32.totalorder %s1640_s16, 1 }
 0x1a2   : > { %s1662_s20 = smov (!%p1430_p4), 3  }
 0x1a3   : > { %814 = sbr.rel (%p1430_p4) target bundleno = 666 (0x29a), region = 76 }
 0x1a8   : > { %v815_v36 = vld [vmem:[#allocation2] sm:$0xf]  ;;  %vm852_vm4 = vcmask 56344  }
 0x1a9   : > { %816 = vxpose.xlu0.b32.start.end [1/1] (short) (narrow) %v815_v36, 8 }
 0x225   : > { %v832_v37 = vpop.trf.xlu0 }
 0x226   : > { %849 = vrot.lane.b32.xlu0 %v832_v37, %s1662_s20 }
 0x298   : > { %v850_v38 = vpop.permute.xlu0 %849 }
 0x299   : > { %853 = vst.msk [vmem:[%s1856_s12] sm:$0xff] %vm852_vm4, %v850_v38 }
 0x29a PF: > { %v854_v39 = vmul.f32 8.0, %v1863_v8  ;;  %v857_v40 = vmul.f32 8.0, %v1865_v9  ;;  %p1433_p5 = scmp.ge.s32.totalorder %s1640_s16, 1 }
 0x29c   : > { %v1431_v41 = vadd.f32 -1.0, %v854_v39  ;;  %v1432_v42 = vadd.f32 -1.0, %v857_v40  ;;  %863 = sbr.rel (%p1433_p5) target bundleno = 1272 (0x4f8), region = 80 }
 0x29e   : > { %v856_v43 = vmul.f32 0.5, %v1431_v41  ;;  %v859_v44 = vmul.f32 0.5, %v1432_v42 }
 0x2a1   : > { %v1663_v45 = vmov 0   ;;  %v1664_v46 = vmov 1   ;;  %v1665_v47 = vmov 0.0   ;;  %vm1666_vm5 = vmmov 0   ;;  %v1434_v48 = vld [vmem:[%s631_s19] ss:$0 sm:$0xff] }
 0x2a2   : > { %1560 = vset.pattern.permute.xlu0 %v1663_v45  ;;  %1463 = vmatprep.subr.mxu0 %v1665_v47  ;;  %v1435_v51 = vld [vmem:[%s638_s24] ss:$0 sm:$0xff]  ;;  %vm898_vm6 = vcmask 523264  }
 0x2a3   : > { %874 = vperm.xlu0 %1560, %v856_v43   ;;  %1465 = vmatprep.mubr.msk.f32.mxu0 %vm1666_vm5, %v1665_v47  ;;  %v897_v61 = vld [vmem:[%s624_s10] sm:$0xff] }
 0x2a7   : > { %1561 = vset.pattern.permute.xlu0 %v1664_v46 }
 0x2a8   : > { %886 = vperm.xlu0 %1561, %v859_v44  }
 0x31e   : > { %v875_v49 = vpop.permute.xlu0 %874 }
 0x31f   : > { %v877_v50 = vsub.f32 %v1434_v48, %v875_v49 }
 0x321   : > { %v890_v52 = vand.u32 2147483647, %v877_v50 }
 0x323   : > { %v887_v53 = vpop.permute.xlu0 %886  ;;  %v891_v55 = vsub.f32 1.0, %v890_v52 }
 0x324   : > { %v889_v54 = vsub.f32 %v1435_v51, %v887_v53 }
 0x325   : > { %v892_v58 = vmax.f32 %v891_v55, 0.0 }
 0x326   : > { %v893_v56 = vand.u32 2147483647, %v889_v54 }
 0x328   : > { %v894_v57 = vsub.f32 1.0, %v893_v56 }
 0x32a   : > { %v895_v59 = vmax.f32 %v894_v57, 0.0 }
 0x32c   : > { %v896_v60 = vmul.f32 %v895_v59, %v892_v58 }
 0x32e   : > { %1464 = vmatpush3.xpose.msk.msra.mxu0 %vm898_vm6, %v896_v60 }
 0x331   : > { %1466 = vmatmul.mubr.msk.f32.vlgmr.msra.gmra.mxu0 %vm898_vm6, %v897_v61 }
 0x3ef   : > { %977 = sbr.rel (%p1421_p1) target bundleno = 1014 (0x3f6), region = 84 }
 0x3f1   : > { %v971_v62 = vpop.f32.mrf.mxu0 }
 0x3f3   : > { %v1467_v63 = vpop.f32.mrf.mxu0 }
 0x3f4   : > { %vm978_vm7 = vcmask 64512  }
 0x3f5   : > { %979 = vst.msk [vmem:[#allocation3] sm:$0xff] %vm978_vm7, %v971_v62 }
 0x3f6 PF: > { %982 = sbr.rel (%p1429_p2) target bundleno = 1024 (0x400), region = 88 }
 0x3fb   : > { %vm985_vm8 = vcmask 64512  }
 0x3fc   : > { %v983_v0 = vld [vmem:[#allocation3] sm:$0xff] }
 0x3fd   : > { %v984_v1 = vadd.f32 %v983_v0, %v971_v62 }
 0x3ff   : > { %986 = vst.msk [vmem:[#allocation3] sm:$0xff] %vm985_vm8, %v984_v1 }
 0x400 PF: > { %989 = sbr.rel (%p1421_p1) target bundleno = 1272 (0x4f8), region = 92  ;;  %s1667_s30 = smov (!%p1421_p1), 7  }
 0x405   : > { %vm1027_vm9 = vcmask 121912  }
 0x406   : > { %v990_v2 = vld [vmem:[#allocation3] sm:$0xff] }
 0x407   : > { %991 = vxpose.xlu0.b32.start.end [1/1] (short) (narrow) %v990_v2, 8 }
 0x483   : > { %v1007_v4 = vpop.trf.xlu0 }
 0x484   : > { %1024 = vrot.lane.b32.xlu0 %v1007_v4, %s1667_s30 }
 0x4f6   : > { %v1025_v5 = vpop.permute.xlu0 %1024 }
 0x4f7   : > { %1028 = vst.msk [vmem:[%s1856_s12] sm:$0xff] %vm1027_vm9, %v1025_v5 }
 0x4f8 PF: > { %1562 = vset.pattern.permute.xlu0 %v1658_v3  ;;  %v1029_v6 = vmul.f32 12.0, %v1863_v8  ;;  %v1032_v7 = vmul.f32 12.0, %v1865_v9  ;;  %1468 = vmatprep.subr.mxu0 %v1660_v17  ;;  %v1443_v3 = vld [vmem:[%s657_s27] ss:$0 sm:$0xff] }
 0x4f9   : > { %1470 = vmatprep.mubr.msk.f32.mxu0 %vm1661_vm1, %v1660_v17  ;;  %v1444_v14 = vld [vmem:[%s664_s29] ss:$0 sm:$0xff] }
 0x4fa   : > { %v1441_v10 = vadd.f32 -1.0, %v1029_v6  ;;  %v1442_v11 = vadd.f32 -1.0, %v1032_v7  ;;  %v1068_v24 = vld [vmem:[%s1831_s18] sm:$0x3f] }
 0x4fc   : > { %v1031_v12 = vmul.f32 0.5, %v1441_v10  ;;  %v1034_v13 = vmul.f32 0.5, %v1442_v11 }
 0x4fe   : > { %1045 = vperm.xlu0 %1562, %v1031_v12  }
 0x502   : > { %1563 = vset.pattern.permute.xlu0 %v1659_v16 }
 0x503   : > { %1057 = vperm.xlu0 %1563, %v1034_v13  }
 0x579   : > { %v1046_v8 = vpop.permute.xlu0 %1045 }
 0x57a   : > { %v1048_v9 = vsub.f32 %v1443_v3, %v1046_v8 }
 0x57c   : > { %v1061_v15 = vand.u32 2147483647, %v1048_v9 }
 0x57e   : > { %v1058_v17 = vpop.permute.xlu0 %1057  ;;  %v1062_v19 = vsub.f32 1.0, %v1061_v15 }
 0x57f   : > { %v1060_v18 = vsub.f32 %v1444_v14, %v1058_v17 }
 0x580   : > { %v1063_v21 = vmax.f32 %v1062_v19, 0.0 }
 0x581   : > { %v1064_v20 = vand.u32 2147483647, %v1060_v18 }
 0x583   : > { %v1065_v16 = vsub.f32 1.0, %v1064_v20 }
 0x585   : > { %v1066_v22 = vmax.f32 %v1065_v16, 0.0 }
 0x587   : > { %v1067_v23 = vmul.f32 %v1066_v22, %v1063_v21 }
 0x589   : > { %1469 = vmatpush3.xpose.msra.mxu0 %v1067_v23 }
 0x58c   : > { %1471 = vmatmul.mubr.f32.vlgmr.msra.gmra.mxu0 %v1068_v24 }
 0x64a   : > { %1141 = sbr.rel (%p1421_p1) target bundleno = 1617 (0x651), region = 96 }
 0x64c   : > { %v1135_v25 = vpop.f32.mrf.mxu0 }
 0x64e   : > { %v1472_v26 = vpop.f32.mrf.mxu0 }
 0x64f   : > { %vm1142_vm10 = vcmask 62464  }
 0x650   : > { %1143 = vst.msk [vmem:[#allocation4] sm:$0x3f] %vm1142_vm10, %v1135_v25 }
 0x651 PF: > { %1146 = sbr.rel (%p1429_p2) target bundleno = 1627 (0x65b), region = 100 }
 0x656   : > { %vm1149_vm11 = vcmask 62464  }
 0x657   : > { %v1147_v27 = vld [vmem:[#allocation4] sm:$0x3f] }
 0x658   : > { %v1148_v28 = vadd.f32 %v1147_v27, %v1135_v25 }
 0x65a   : > { %1150 = vst.msk [vmem:[#allocation4] sm:$0x3f] %vm1149_vm11, %v1148_v28 }
 0x65b PF: > { %1153 = sbr.rel (%p1430_p4) target bundleno = 1875 (0x753), region = 104  ;;  %s1668_s21 = smov (!%p1430_p4), 15  }
 0x660   : > { %vm1191_vm12 = vcmask 171128  }
 0x661   : > { %v1154_v29 = vld [vmem:[#allocation4] sm:$0x3f] }
 0x662   : > { %1155 = vxpose.xlu0.b32.start.end [1/1] (short) (narrow) %v1154_v29, 8 }
 0x6de   : > { %v1171_v30 = vpop.trf.xlu0 }
 0x6df   : > { %1188 = vrot.lane.b32.xlu0 %v1171_v30, %s1668_s21 }
 0x751   : > { %v1189_v31 = vpop.permute.xlu0 %1188 }
 0x752   : > { %1192 = vst.msk [vmem:[%s1856_s12] sm:$0xff] %vm1191_vm12, %v1189_v31 }
 0x753 PF: > { %s2036_s18 = sld [smem:[#allocation9_spill]]  ;;  %s1449_s29 = sshll.u32 %s1644_s17, 7 }
 0x754   : > { %s2038_s15 = sld [smem:[#allocation22_spill]]  ;;  %s1207_s11 = sshll.u32 %s1856_s12, 4  ;;  %s1208_s11 = int_to_ptr.vmem [resolvable:$true] %s1207_s11 }
 0x755   : > { %s1564_s13 = scalar_lea.vmem %s1208_s11, 128  ;;  %s1669_s0 = smov [#allocation5]  }
 0x756   : > { %p1565_p6 = scmp.ne.s32.totalorder %s1208_s11, %s1564_s13  ;;  %s1568_s26 = sshll.u32 %s1669_s0, 4  ;;  %s1569_s26 = int_to_ptr.vmem [resolvable:$false] %s1568_s26 }
 0x757   : > { %s1570_s23 = scalar_lea.vmem %s1569_s26, 256  ;;  %p1571_p10 = scmp.lt.s32.totalorder %s1208_s11, %s1569_s26 }
 0x758   : > { %p1566_p7 = pnand %p1565_p6, %p1774_p3  ;;  %p1572_p11 = scmp.lt.s32.totalorder %s1570_s23, %s1564_s13 }
 0x759   : > { %s2040_s20 = sand.u32 1, %s2036_s18  }
 0x75a   : > { %s2039_s25 = smov %s2038_s15  ;;  %s1205_s16 = scalar_lea.hbm %s2038_s15, %s1449_s29 }
 0x75b   : > { %s1194_s22 = scalar_lea.sflag [#allocation6], %s2040_s20  ;;  %p1567_p8 = pneg %p1566_p7 }
 0x75c   : > { %p1573_p12 = por %p1572_p11, %p1571_p10 }
 0x75e   : > { %p1574_p13 = pnand %p1573_p12, %p1567_p8 }
 0x760   : > { %1577 = shalt.err (!%p1574_p13)
}
 0x761   : > { %s1578_s17 = scalar_lea.hbm %s1205_s16, 128  ;;  %s1582_s30 = scalar_lea.hbm %s2039_s25, 256 }
 0x762   : > { %p1579_p0 = scmp.ne.s32.totalorder %s1205_s16, %s1578_s17  ;;  %p1583_p4 = scmp.lt.s32.totalorder %s1205_s16, %s2039_s25 }
 0x763   : > { %p1584_p5 = scmp.lt.s32.totalorder %s1582_s30, %s1578_s17 }
 0x764   : > { %p1580_p1 = pnand %p1579_p0, %p1774_p3 }
 0x765   : > { %p1585_p6 = por %p1584_p5, %p1583_p4 }
 0x766   : > { %p1581_p2 = pneg %p1580_p1 }
 0x768   : > { %p1586_p7 = pnand %p1585_p6, %p1581_p2 }
 0x76a   : > { %1589 = shalt.err (!%p1586_p7)
}
 0x76b   : > { %1473 = dma.vmem_to_hbm [thread:$0]  (%p1774_p3), %s1208_s11, 128, %s1205_s16, %s1194_s22  }
 0x76c PF: > { %s2041_s10 = sld [smem:[#allocation13_spill]] }
 0x76d   : > { %s2042_s1 = sld [smem:[#allocation8_spill]] }
 0x772   : > { %p1479_p8 = scmp.ge.s32.totalorder %s2041_s10, 2 }
 0x773   : > { %s1219_s18 = sand.u32 1, %s2042_s1  }
 0x774   : > { %p1476_p10 = pnand %p1479_p8, %p1784_p9  ;;  %s1220_s29 = scalar_lea.sflag [#allocation6], %s1219_s18 }
 0x776   : > { %p1477_p11 = pneg %p1476_p10 }
 0x778   : > { %1623 = dma.done.wait (%p1477_p11), %s1220_s29, 128  }
 0x779   : > { %1625 = vsyncadd (%p1477_p11), %s1220_s29, 4294967168  ;;  %s23_s20 = sadd.s32 1, %s2041_s10   ;;  %s2044_s13 = sld [smem:[#allocation9_spill]] }
 0x77a   : > { %p20_p12 = scmp.ge.s32.totalorder %s23_s20, 6   ;;  %s2045_s14 = sld [smem:[#allocation10_spill]] }
 0x77b   : > { %s2046_s15 = sld [smem:[#allocation18_spill]] }
 0x77c   : > { %s2047_s16 = sld [smem:[#allocation11_spill]]  ;;  %22 = sbr.rel (!%p20_p12) target bundleno = 10 (0xa), region = 166 }
 0x77d   : > { %s2048_s17 = sld [smem:[#allocation12_spill]] }
 0x77e   : > { %s2049_s18 = sld [smem:[#allocation14_spill]] }
 0x77f   : > { %s2050_s19 = sld [smem:[#allocation16_spill]] }
 0x781   :  { %1225 = vsyncpa [#allocation6], 1 }
 0x782   :  { %1227 = vsyncpa [#allocation6 + $0x1], 1 }

</bundles_post_ra>
